<compile_context>
chip_gen: v7x
topology: tpu7x:2x2x1
jax: 0.10.0
libtpu: 0.0.40
codegen_flags: <defaults>
</compile_context>

<pallas_src>
import jax
import jax.numpy as jnp
from jax.experimental import pallas as pl
from jax.experimental.pallas import tpu as pltpu


def _round_up(x, m):
    return ((x + m - 1) // m) * m


def _permutation_kernel(perm_ref, x_ref, out_ref):
    """out[b, j] = x[b, perm[j]] for one (TB, D) batch tile.

    perm_ref: (1, D)  int32 VMEM (resident across all batch tiles)
    x_ref:    (TB, D) VMEM
    out_ref:  (TB, D) VMEM
    """
    x = x_ref[...]
    # Sublane broadcast of the index row, then a lane gather (XLU); indices
    # are a valid permutation so they are promised in bounds.
    idx = jnp.broadcast_to(perm_ref[...], x.shape)
    out_ref[...] = jnp.take_along_axis(x, idx, axis=1, mode="promise_in_bounds")


def _pick_block_rows(batch, d, itemsize):
    """Largest sublane-aligned batch tile with a <= ~4 MiB block footprint."""
    budget_elems = (4 * 1024 * 1024) // max(itemsize, 1)
    tb = max(budget_elems // max(d, 1), 8)
    tb = min(tb, 1024)              # per-step overhead (~0.35 us) already amortized
    tb = max((tb // 8) * 8, 8)      # sublane multiple of 8
    return min(tb, _round_up(batch, 8))


@jax.jit
def permutation_forward(x, permutation):
    """Pallas equivalent of Permutation.forward for 2-D (batch, features) inputs.

    Args:
      x:           (B, D) array.
      permutation: (D,) integer permutation of the feature axis (dim=1).
    Returns:
      (outputs, logabsdet): permuted features (B, D) and zeros (B,).
    """
    b, d = x.shape
    perm2d = permutation.astype(jnp.int32).reshape(1, d)

    tb = _pick_block_rows(b, d, x.dtype.itemsize)
    padded_b = _round_up(b, tb)
    x_in = x if padded_b == b else jnp.pad(x, ((0, padded_b - b), (0, 0)))

    out = pl.pallas_call(
        _permutation_kernel,
        out_shape=jax.ShapeDtypeStruct((padded_b, d), x.dtype),
        grid_spec=pl.GridSpec(
            grid=(padded_b // tb,),
            in_specs=[
                pl.BlockSpec((1, d), lambda i: (0, 0)),    # permutation indices, resident
                pl.BlockSpec((tb, d), lambda i: (i, 0)),   # x batch tile
            ],
            out_specs=pl.BlockSpec((tb, d), lambda i: (i, 0)),
        ),
        compiler_params=pltpu.CompilerParams(
            dimension_semantics=("parallel",)),
    )(perm2d, x_in)

    outputs = out if padded_b == b else out[:b]
    # |det| of a permutation is 1 -> logabsdet == 0, independent of the input;
    # produced here instead of as a lane-width-1 kernel output.
    logabsdet = jnp.zeros((b,), dtype=x.dtype)
    return outputs, logabsdet


def _reference(x, permutation):
    """Plain-JAX reference mirroring Permutation._permute (dim=1)."""
    return x[:, permutation], jnp.zeros((x.shape[0],), dtype=x.dtype)


if __name__ == "__main__":
    key = jax.random.PRNGKey(0)
    kx, kp = jax.random.split(key)

    B, D = 8, 128
    x = jax.random.normal(kx, (B, D), dtype=jnp.float32)
    permutation = jax.random.permutation(kp, D).astype(jnp.int32)

    out, logabsdet = permutation_forward(x, permutation)
    out = jax.block_until_ready(out)
    logabsdet = jax.block_until_ready(logabsdet)

    ref_out, ref_logdet = _reference(x, permutation)
    assert out.shape == (B, D) and logabsdet.shape == (B,)
    assert jnp.array_equal(out, ref_out)
    assert jnp.array_equal(logabsdet, ref_logdet)

    print("KERNEL_OK")
</pallas_src>

<mosaic_0001>
module attributes {stable_mosaic.version = 11 : i64} {
  func.func @_permutation_kernel(%arg0: i32, %arg1: memref<1x128xi32, #tpu.memory_space<vmem>>, %arg2: memref<8x128xf32, #tpu.memory_space<vmem>>, %arg3: memref<8x128xf32, #tpu.memory_space<vmem>>) attributes {dimension_semantics = [#tpu.dimension_semantics<parallel>], iteration_bounds = array<i64: 1>, scalar_prefetch = 0 : i64, scratch_operands = 0 : i64, tpu.core_type = #tpu.core_type<tc>, window_params = [{pipeline_mode = #tpu.pipeline_mode<synchronous>, transform_indices = @transform_0, window_bounds = array<i64: 1, 128>}, {transform_indices = @transform_1, window_bounds = array<i64: 8, 128>}, {transform_indices = @transform_2, window_bounds = array<i64: 8, 128>}]} {
    %c0 = arith.constant 0 : index
    %c0_0 = arith.constant 0 : index
    %0 = vector.load %arg2[%c0, %c0_0] : memref<8x128xf32, #tpu.memory_space<vmem>>, vector<8x128xf32>
    %c0_1 = arith.constant 0 : index
    %c0_2 = arith.constant 0 : index
    %1 = vector.load %arg1[%c0_1, %c0_2] : memref<1x128xi32, #tpu.memory_space<vmem>>, vector<1x128xi32>
    %2 = vector.shape_cast %1 : vector<1x128xi32> to vector<1x128xi32>
    %3 = vector.broadcast %2 : vector<1x128xi32> to vector<8x128xi32>
    %4 = vector.shape_cast %3 : vector<8x128xi32> to vector<8x128x1xi32>
    %5 = vector.shape_cast %4 : vector<8x128x1xi32> to vector<8x128xi32>
    %6 = tpu.dynamic_gather %0[%5] in [1] : vector<8x128xf32>, vector<8x128xi32> -> vector<8x128xf32>
    %c0_3 = arith.constant 0 : index
    %c0_4 = arith.constant 0 : index
    %7 = vector.load %arg3[%c0_3, %c0_4] : memref<8x128xf32, #tpu.memory_space<vmem>>, vector<8x128xf32>
    tpu.vector_store %arg3[%c0_3, %c0_4], %6 {strides = array<i32>} : memref<8x128xf32, #tpu.memory_space<vmem>>, vector<8x128xf32>,
    return
  }
  func.func @transform_0(%arg0: i32) -> (i32, i32) {
    %c0_i32 = arith.constant 0 : i32
    %c0_i32_0 = arith.constant 0 : i32
    %c0_i32_1 = arith.constant 0 : i32
    return %c0_i32, %c0_i32_0 : i32, i32
  }
  func.func @transform_1(%arg0: i32) -> (i32, i32) {
    %c0_i32 = arith.constant 0 : i32
    %c0_i32_0 = arith.constant 0 : i32
    return %arg0, %c0_i32 : i32, i32
  }
  func.func @transform_2(%arg0: i32) -> (i32, i32) {
    %c0_i32 = arith.constant 0 : i32
    %c0_i32_0 = arith.constant 0 : i32
    return %arg0, %c0_i32 : i32, i32
  }
}

</mosaic_0001>

<bundles_post_ra>
// kernel: permutation_forward.1
= control target key start
LH: loop header
LB: loop body
LE: loop exit
PB: predicated region body
PF: predicated region fallthrough
CT: control target
= control target key end

     0   :  { %7 = vsyncpa [#allocation3], 0  ;;  %s145_s0 = inlined_call_operand.vmem [shape: s32[1,128], index: 0, kind: input, shape index: {}]   ;;  %s146_s1 = inlined_call_operand.hbm [shape: f32[8,128], index: 1, kind: input, shape index: {}]   ;;  %s147_s2 = inlined_call_operand.hbm [shape: f32[8,128], index: 2, kind: output, shape index: {}]  }
   0x1   :  { %8 = vsyncpa [#allocation4], 0  ;;  %s101_s9 = smov [#allocation2]   ;;  %s53_s13 = scalar_lea.hbm %s146_s1, 128 }
   0x2   :  { %s17_s10 = sshll.u32 %s101_s9, 4  ;;  %p54_p0 = scmp.ne.s32.totalorder %s146_s1, %s53_s13  ;;  %s18_s10 = int_to_ptr.vmem [resolvable:$true] %s17_s10 }
   0x3   :  { %p57_p1 = scmp.lt.u32.totalorder %s53_s13, %s146_s1 }
   0x5   :  { %p59_p2 = pnand %p57_p1, %p54_p0 }
   0x7   :  { %62 = shalt.err (!%p59_p2)
}
   0x8   :  { %s63_s18 = scalar_lea.vmem %s18_s10, 128  ;;  %p68_p4 = scmp.lt.s32.totalorder %s18_s10, %s18_s10 }
   0x9   :  { %p64_p3 = scmp.ne.s32.totalorder %s18_s10, %s63_s18  ;;  %p69_p5 = scmp.lt.s32.totalorder %s63_s18, %s63_s18 }
   0xb   :  { %p70_p6 = por %p69_p5, %p68_p4 }
   0xd   :  { %p71_p7 = pnand %p70_p6, %p64_p3 }
   0xf   :  { %74 = shalt.err (!%p71_p7)
}
  0x10   :  { %20 = dma.hbm_to_vmem [thread:$0]  %s146_s1, 128, %s18_s10, [#allocation3]  }
  0x11   :  { %97 = dma.done.wait [#allocation3], 128  }
  0x12   :  { %98 = vsyncadd [#allocation3], 4294967168  ;;  %v49_v0 = vld [vmem:[%s145_s0] ss:$0 sm:$0xff]  ;;  %s102_s23 = smov [#allocation5]  }
  0x13   :  { %52 = vset.pattern.permute.xlu0 %v49_v0  ;;  %v24_v1 = vld [vmem:[#allocation2] sm:$0xff]  ;;  %s40_s24 = sshll.u32 %s102_s23, 4  ;;  %s41_s24 = int_to_ptr.vmem [resolvable:$true] %s40_s24 }
  0x14   :  { %s75_s25 = scalar_lea.vmem %s41_s24, 128  ;;  %p80_p9 = scmp.lt.s32.totalorder %s41_s24, %s41_s24 }
  0x15   :  { %p76_p8 = scmp.ne.s32.totalorder %s41_s24, %s75_s25  ;;  %p81_p10 = scmp.lt.s32.totalorder %s75_s25, %s75_s25 }
  0x17   :  { %31 = vperm.xlu0 %52, %v24_v1   ;;  %p82_p11 = por %p81_p10, %p80_p9 }
  0x19   :  { %p83_p12 = pnand %p82_p11, %p76_p8 }
  0x96   :  { %v32_v2 = vpop.permute.xlu0 %31 }
  0x97   :  { %33 = vst [vmem:[#allocation5] sm:$0xff] %v32_v2 }
  0x98   :  { %86 = shalt.err (!%p83_p12)
}
  0x99   :  { %s87_s27 = scalar_lea.hbm %s147_s2, 128 }
  0x9a   :  { %p88_p13 = scmp.ne.s32.totalorder %s147_s2, %s87_s27  ;;  %p91_p0 = scmp.lt.u32.totalorder %s87_s27, %s147_s2 }
  0x9c   :  { %p93_p1 = pnand %p91_p0, %p88_p13 }
  0x9e   :  { %96 = shalt.err (!%p93_p1)
}
  0x9f   :  { %43 = dma.vmem_to_hbm [thread:$0]  %s41_s24, 128, %s147_s2, [#allocation4]  }
  0xa0   :  { %99 = dma.done.wait [#allocation4], 128  }
  0xa1   :  { %100 = vsyncadd [#allocation4], 4294967168 }
  0xa2   :  { %47 = vsyncpa [#allocation3], 1 }
  0xa3   :  { %48 = vsyncpa [#allocation4], 1 }

</bundles_post_ra>
